<compile_context>
chip_gen: v7x
topology: tpu7x:2x2x1
jax: 0.10.0
libtpu: 0.0.40
codegen_flags: <defaults>
</compile_context>

<pallas_src>
import functools
import math

import jax
import jax.numpy as jnp
from jax import lax
from jax.experimental import pallas as pl
from jax.experimental.pallas import tpu as pltpu


def _uniform_bits(gidx_u32, seed_u32):
    """Counter-based per-element hash -> uniform uint32 (lowbias32-style mixer)."""
    h = gidx_u32 * jnp.uint32(0x9E3779B1) + seed_u32 * jnp.uint32(0x85EBCA77)
    h = h ^ (h >> 16)
    h = h * jnp.uint32(0x7FEB352D)
    h = h ^ (h >> 15)
    h = h * jnp.uint32(0x846CA68B)
    h = h ^ (h >> 16)
    return h


def _pe_kernel(seed_ref, x_ref, pe_ref, o_ref, *, p: float, training: bool):
    # x_ref: (TS, B, D); pe_ref: (TS, 1, D) -> broadcast add over the batch dim.
    y = x_ref[...] + pe_ref[...]

    if training and p >= 1.0:
        # Degenerate case: drop everything (avoids uint32 threshold overflow).
        y = jnp.zeros_like(y)
    elif training and p > 0.0:
        ts, b, d = x_ref.shape
        row0 = pl.program_id(0) * ts  # first sequence row of this tile
        i_s = lax.broadcasted_iota(jnp.int32, (ts, b, d), 0) + row0
        i_b = lax.broadcasted_iota(jnp.int32, (ts, b, d), 1)
        i_d = lax.broadcasted_iota(jnp.int32, (ts, b, d), 2)
        gidx = (i_s * (b * d) + i_b * d + i_d).astype(jnp.uint32)
        seed_u32 = seed_ref[0].astype(jnp.uint32)
        bits = _uniform_bits(gidx, seed_u32)
        # Compare in the 24-bit range with a signed int32 compare (no uint cmp needed).
        r24 = (bits >> 8).astype(jnp.int32)                      # uniform in [0, 2^24)
        threshold = jnp.int32(min(int(round(p * (1 << 24))), 1 << 24))
        keep = r24 >= threshold
        scale = jnp.asarray(1.0 / (1.0 - p), dtype=y.dtype)
        y = jnp.where(keep, y * scale, jnp.zeros_like(y))

    o_ref[...] = y.astype(o_ref.dtype)


def make_positional_encoding_table(d_model: int, max_len: int = 5000) -> jnp.ndarray:
    """Deterministic sinusoidal table, identical to the PyTorch __init__."""
    position = jnp.arange(max_len, dtype=jnp.float32)[:, None]            # (max_len, 1)
    div_term = jnp.exp(
        jnp.arange(0, d_model, 2, dtype=jnp.float32) * (-math.log(10000.0) / d_model)
    )                                                                      # (d_model/2,)
    pe = jnp.zeros((max_len, d_model), dtype=jnp.float32)
    pe = pe.at[:, 0::2].set(jnp.sin(position * div_term))
    pe = pe.at[:, 1::2].set(jnp.cos(position * div_term))
    return pe[:, None, :]                                                  # (max_len, 1, d_model)


def positional_encoding_forward(x, pe, *, p: float = 0.1, training: bool = False,
                                seed: int = 0, target_tile_bytes: int = 2 * 1024 * 1024):
    """x: (S, B, D); pe: (max_len, 1, D). Returns (S, B, D) = dropout(x + pe[:S])."""
    S, B, D = x.shape
    itemsize = jnp.dtype(x.dtype).itemsize
    pe_slice = pe[:S].astype(x.dtype)                    # (S, 1, D), DMA in x's dtype
    seed_arr = jnp.array([seed], dtype=jnp.int32)

    # Tile TS sequence rows per grid step: this is a pure mem-bound kernel, so use
    # large rectangular tiles (~2 MiB of x per step) to approach HBM roofline.
    row_bytes = B * D * itemsize
    ts = int(max(1, min(S, target_tile_bytes // max(1, row_bytes))))
    grid = (pl.cdiv(S, ts),)

    # Double-buffered VMEM budget: (x tile + out tile + pe tile) x 2, plus slack.
    # Capped conservatively so the same sizing is safe on v7x (64 MiB physical VMEM).
    tile_bytes = ts * row_bytes
    pe_tile_bytes = ts * D * itemsize
    vmem_limit = int(min(64 * 1024 * 1024,
                         max(16 * 1024 * 1024,
                             2 * (2 * tile_bytes + pe_tile_bytes) + (4 << 20))))

    kernel = functools.partial(_pe_kernel, p=float(p), training=bool(training))

    # NOTE: for D < 128 (as in the tiny demo) stores are masked partial stores; the
    # kernel targets realistic transformer widths (D >= 128) where the output is
    # lane-dense.  For eval-mode-only callers, prefer fusing `x + pe` into the
    # adjacent op instead of a standalone memory pass.
    return pl.pallas_call(
        kernel,
        out_shape=jax.ShapeDtypeStruct((S, B, D), x.dtype),
        grid_spec=pltpu.PrefetchScalarGridSpec(
            num_scalar_prefetch=1,                       # seed lands in SMEM
            grid=grid,
            in_specs=[
                pl.BlockSpec((ts, B, D), lambda i, seed: (i, 0, 0)),   # x tile
                pl.BlockSpec((ts, 1, D), lambda i, seed: (i, 0, 0)),   # pe tile
            ],
            out_specs=pl.BlockSpec((ts, B, D), lambda i, seed: (i, 0, 0)),
        ),
        compiler_params=pltpu.CompilerParams(
            dimension_semantics=("parallel",),           # independent seq tiles
            vmem_limit_bytes=vmem_limit,
        ),
    )(seed_arr, x, pe_slice)


if __name__ == "__main__":
    # Small shapes consistent with the module: seq=8, batch=2, d_model=32.
    d_model = 32
    max_len = 64
    S, B = 8, 2

    key = jax.random.PRNGKey(0)
    x = jax.random.normal(key, (S, B, d_model), dtype=jnp.float32)
    pe = make_positional_encoding_table(d_model, max_len)

    # Eval-mode forward (dropout is identity), matching module.eval() semantics.
    out = positional_encoding_forward(x, pe, p=0.1, training=False)
    out = jax.block_until_ready(out)
    ref = x + pe[:S]
    assert out.shape == (S, B, d_model)
    assert jnp.allclose(out, ref, atol=1e-6), "eval-mode mismatch vs reference"

    # Training-mode dropout (in-kernel counter-based hash RNG; keep/scale semantics
    # match torch dropout, but the RNG stream differs from torch).
    # TODO(synk): PyTorch's exact dropout RNG stream is not reproducible here.
    p = 0.1
    out_train = positional_encoding_forward(x, pe, p=p, training=True, seed=1234)
    out_train = jax.block_until_ready(out_train)
    assert out_train.shape == (S, B, d_model)
    scaled = ref / (1.0 - p)
    ok = jnp.isclose(out_train, scaled, atol=1e-5) | (out_train == 0.0)
    assert bool(jnp.all(ok)), "training-mode values must be 0 or (x+pe)/(1-p)"
    drop_frac = float(jnp.mean((out_train == 0.0).astype(jnp.float32)))
    assert drop_frac < 0.5, f"dropout rate implausible: {drop_frac}"

    print("KERNEL_OK")
</pallas_src>

<mosaic_0001>
module attributes {stable_mosaic.version = 11 : i64} {
  func.func @_pe_kernel(%arg0: i32, %arg1: memref<1xi32, #tpu.memory_space<smem>>, %arg2: memref<8x2x32xf32, #tpu.memory_space<vmem>>, %arg3: memref<8x1x32xf32, #tpu.memory_space<vmem>>, %arg4: memref<8x2x32xf32, #tpu.memory_space<vmem>>) attributes {dimension_semantics = [#tpu.dimension_semantics<parallel>], iteration_bounds = array<i64: 1>, scalar_prefetch = 1 : i64, scratch_operands = 0 : i64, tpu.core_type = #tpu.core_type<tc>, window_params = [{transform_indices = @transform_0, window_bounds = array<i64: 8, 2, 32>}, {transform_indices = @transform_1, window_bounds = array<i64: 8, 1, 32>}, {transform_indices = @transform_2, window_bounds = array<i64: 8, 2, 32>}]} {
    %c0 = arith.constant 0 : index
    %c0_0 = arith.constant 0 : index
    %c0_1 = arith.constant 0 : index
    %0 = vector.load %arg2[%c0, %c0_0, %c0_1] : memref<8x2x32xf32, #tpu.memory_space<vmem>>, vector<8x2x32xf32>
    %c0_2 = arith.constant 0 : index
    %c0_3 = arith.constant 0 : index
    %c0_4 = arith.constant 0 : index
    %1 = vector.load %arg3[%c0_2, %c0_3, %c0_4] : memref<8x1x32xf32, #tpu.memory_space<vmem>>, vector<8x1x32xf32>
    %2 = vector.broadcast %1 : vector<8x1x32xf32> to vector<8x2x32xf32>
    %3 = arith.addf %0, %2 : vector<8x2x32xf32>
    %c0_5 = arith.constant 0 : index
    %c0_6 = arith.constant 0 : index
    %c0_7 = arith.constant 0 : index
    %4 = vector.load %arg4[%c0_5, %c0_6, %c0_7] : memref<8x2x32xf32, #tpu.memory_space<vmem>>, vector<8x2x32xf32>
    tpu.vector_store %arg4[%c0_5, %c0_6, %c0_7], %3 {strides = array<i32>} : memref<8x2x32xf32, #tpu.memory_space<vmem>>, vector<8x2x32xf32>,
    return
  }
  func.func @transform_0(%arg0: i32, %arg1: memref<1xi32, #tpu.memory_space<smem>>) -> (i32, i32, i32) {
    %c0_i32 = arith.constant 0 : i32
    %c0_i32_0 = arith.constant 0 : i32
    %c0_i32_1 = arith.constant 0 : i32
    return %arg0, %c0_i32, %c0_i32_0 : i32, i32, i32
  }
  func.func @transform_1(%arg0: i32, %arg1: memref<1xi32, #tpu.memory_space<smem>>) -> (i32, i32, i32) {
    %c0_i32 = arith.constant 0 : i32
    %c0_i32_0 = arith.constant 0 : i32
    %c0_i32_1 = arith.constant 0 : i32
    return %arg0, %c0_i32, %c0_i32_0 : i32, i32, i32
  }
  func.func @transform_2(%arg0: i32, %arg1: memref<1xi32, #tpu.memory_space<smem>>) -> (i32, i32, i32) {
    %c0_i32 = arith.constant 0 : i32
    %c0_i32_0 = arith.constant 0 : i32
    %c0_i32_1 = arith.constant 0 : i32
    return %arg0, %c0_i32, %c0_i32_0 : i32, i32, i32
  }
}

</mosaic_0001>

<bundles_post_ra>
// kernel: tpu_custom_call.1
= control target key start
LH: loop header
LB: loop body
LE: loop exit
PB: predicated region body
PF: predicated region fallthrough
CT: control target
= control target key end

     0   :  { %9 = vsyncpa [#allocation5], 0  ;;  %s308_s0 = inlined_call_operand.<no memory space> [shape: s32[1], index: 0, kind: input, shape index: {}]   ;;  %s309_s1 = inlined_call_operand.hbm [shape: f32[8,2,32], index: 1, kind: input, shape index: {}]   ;;  %s310_s2 = inlined_call_operand.hbm [shape: f32[8,1,32], index: 2, kind: input, shape index: {}]   ;;  %s311_s3 = inlined_call_operand.hbm [shape: f32[8,2,32], index: 3, kind: output, shape index: {}]  }
   0x1   :  { %10 = vsyncpa [#allocation8], 0 }
   0x2   :  { %11 = vsyncpa [#allocation6], 0  ;;  %s228_s12 = smov [#allocation4]   ;;  %s156_s16 = scalar_lea.hbm %s309_s1, 256 }
   0x3   :  { %s17_s13 = sshll.u32 %s228_s12, 4  ;;  %p157_p0 = scmp.ne.s32.totalorder %s309_s1, %s156_s16  ;;  %s18_s13 = int_to_ptr.vmem [resolvable:$true] %s17_s13 }
   0x4   :  { %p160_p1 = scmp.lt.u32.totalorder %s156_s16, %s309_s1 }
   0x6   :  { %p162_p2 = pnand %p160_p1, %p157_p0 }
   0x8   :  { %165 = shalt.err (!%p162_p2)
}
   0x9   :  { %s166_s20 = scalar_lea.vmem %s18_s13, 256  ;;  %p171_p4 = scmp.lt.s32.totalorder %s18_s13, %s18_s13 }
   0xa   :  { %p167_p3 = scmp.ne.s32.totalorder %s18_s13, %s166_s20  ;;  %p172_p5 = scmp.lt.s32.totalorder %s166_s20, %s166_s20 }
   0xc   :  { %p173_p6 = por %p172_p5, %p171_p4 }
   0xe   :  { %p174_p7 = pnand %p173_p6, %p167_p3 }
  0x10   :  { %177 = shalt.err (!%p174_p7)
}
  0x11   :  { %s229_s21 = smov 32   ;;  %s230_s22 = smov 2  }
  0x12   :  { %23 = dma.hbm_to_vmem [thread:$0]  %s309_s1, 256, %s18_s13, [#allocation5], %s229_s21, %s229_s21, %s230_s22  }
  0x13   :  { %s231_s25 = smov [#allocation7]   ;;  %s178_s29 = scalar_lea.hbm %s310_s2, 128 }
  0x14   :  { %s29_s26 = sshll.u32 %s231_s25, 4  ;;  %p179_p8 = scmp.ne.s32.totalorder %s310_s2, %s178_s29  ;;  %s30_s26 = int_to_ptr.vmem [resolvable:$true] %s29_s26 }
  0x15   :  { %p182_p9 = scmp.lt.u32.totalorder %s178_s29, %s310_s2 }
  0x17   :  { %p184_p10 = pnand %p182_p9, %p179_p8 }
  0x19   :  { %187 = shalt.err (!%p184_p10)
}
  0x1a   :  { %s188_s7 = scalar_lea.vmem %s30_s26, 128  ;;  %p193_p12 = scmp.lt.s32.totalorder %s30_s26, %s30_s26 }
  0x1b   :  { %p189_p11 = scmp.ne.s32.totalorder %s30_s26, %s188_s7  ;;  %p194_p13 = scmp.lt.s32.totalorder %s188_s7, %s188_s7 }
  0x1d   :  { %p195_p0 = por %p194_p13, %p193_p12 }
  0x1f   :  { %p196_p1 = pnand %p195_p0, %p189_p11 }
  0x21   :  { %199 = shalt.err (!%p196_p1)
}
  0x22   :  { %s232_s1 = smov 16   ;;  %s233_s8 = smov 1  }
  0x23   :  { %35 = dma.hbm_to_vmem [thread:$0]  %s310_s2, 128, %s30_s26, [#allocation8], %s232_s1, %s232_s1, %s233_s8  }
  0x24   :  { %222 = dma.done.wait [#allocation5], 256  }
  0x25   :  { %223 = vsyncadd [#allocation5], 4294967040 }
  0x26   :  { %224 = dma.done.wait [#allocation8], 128  }
  0x27   :  { %225 = vsyncadd [#allocation8], 4294967168  ;;  %vm114_vm0 = vcmask 254976   ;;  %s234_s11 = smov [#allocation9]   ;;  %v42_v0 = vld [vmem:[#allocation4] sm:$0x3] }
  0x28   :  { %s282_s12 = sshll.u32 %s234_s11, 4  ;;  %v141_v1 = vld [vmem:[#allocation7] ss:$0 sm:$0xff]  ;;  %v43_v2 = vld [vmem:[#allocation4 + $0x2] sm:$0x3]  ;;  %s129_s12 = int_to_ptr.vmem [resolvable:$true] %s282_s12 }
  0x29   :  { %v106_v3 = vadd.f32 %v141_v1, %v42_v0  ;;  %v142_v4 = vld [vmem:[#allocation7 + $0x1] ss:$0 sm:$0xff]  ;;  %v44_v5 = vld [vmem:[#allocation4 + $0x4] sm:$0x3]  ;;  %v143_v6 = vld [vmem:[#allocation7 + $0x2] ss:$0 sm:$0xff]  ;;  %p205_p3 = scmp.lt.s32.totalorder %s129_s12, %s129_s12 }
  0x2a   :  { %v107_v7 = vadd.f32 %v142_v4, %v43_v2  ;;  %v108_v8 = vadd.f32 %v143_v6, %v44_v5  ;;  %v45_v9 = vld [vmem:[#allocation4 + $0x6] sm:$0x3]  ;;  %v144_v10 = vld [vmem:[#allocation7 + $0x3] ss:$0 sm:$0xff]  ;;  %v46_v11 = vld [vmem:[#allocation4 + $0x8] sm:$0x3] }
  0x2b   :  { %115 = vst.msk [vmem:[#allocation9] sm:$0x3] %vm114_vm0, %v106_v3  ;;  %v109_v12 = vadd.f32 %v144_v10, %v45_v9  ;;  %v145_v13 = vld [vmem:[#allocation7 + $0x4] ss:$0 sm:$0xff]  ;;  %v47_v14 = vld [vmem:[#allocation4 + $0xa] sm:$0x3] }
  0x2c   :  { %v146_v15 = vld [vmem:[#allocation7 + $0x5] ss:$0 sm:$0xff]  ;;  %116 = vst.msk [vmem:[#allocation9 + $0x2] sm:$0x3] %vm114_vm0, %v107_v7  ;;  %117 = vst.msk [vmem:[#allocation9 + $0x4] sm:$0x3] %vm114_vm0, %v108_v8  ;;  %v110_v16 = vadd.f32 %v145_v13, %v46_v11 }
  0x2d   :  { %v111_v17 = vadd.f32 %v146_v15, %v47_v14  ;;  %v48_v18 = vld [vmem:[#allocation4 + $0xc] sm:$0x3]  ;;  %v147_v19 = vld [vmem:[#allocation7 + $0x6] ss:$0 sm:$0xff]  ;;  %v49_v20 = vld [vmem:[#allocation4 + $0xe] sm:$0x3] }
  0x2e   :  { %118 = vst.msk [vmem:[#allocation9 + $0x6] sm:$0x3] %vm114_vm0, %v109_v12  ;;  %v112_v21 = vadd.f32 %v147_v19, %v48_v18  ;;  %v148_v22 = vld [vmem:[#allocation7 + $0x7] ss:$0 sm:$0xff]  ;;  %119 = vst.msk [vmem:[#allocation9 + $0x8] sm:$0x3] %vm114_vm0, %v110_v16 }
  0x2f   :  { %120 = vst.msk [vmem:[#allocation9 + $0xa] sm:$0x3] %vm114_vm0, %v111_v17  ;;  %v113_v23 = vadd.f32 %v148_v22, %v49_v20  ;;  %s200_s2 = scalar_lea.vmem %s129_s12, 256 }
  0x30   :  { %121 = vst.msk [vmem:[#allocation9 + $0xc] sm:$0x3] %vm114_vm0, %v112_v21  ;;  %p201_p2 = scmp.ne.s32.totalorder %s129_s12, %s200_s2  ;;  %p206_p4 = scmp.lt.s32.totalorder %s200_s2, %s200_s2 }
  0x31   :  { %122 = vst.msk [vmem:[#allocation9 + $0xe] sm:$0x3] %vm114_vm0, %v113_v23 }
  0x32   :  { %p207_p5 = por %p206_p4, %p205_p3 }
  0x34   :  { %p208_p6 = pnand %p207_p5, %p201_p2 }
  0x36   :  { %211 = shalt.err (!%p208_p6)
}
  0x37   :  { %s212_s15 = scalar_lea.hbm %s311_s3, 256 }
  0x38   :  { %p213_p7 = scmp.ne.s32.totalorder %s311_s3, %s212_s15  ;;  %p216_p8 = scmp.lt.u32.totalorder %s212_s15, %s311_s3 }
  0x3a   :  { %p218_p9 = pnand %p216_p8, %p213_p7 }
  0x3c   :  { %221 = shalt.err (!%p218_p9)
}
  0x3d   :  { %134 = dma.vmem_to_hbm [thread:$0]  %s129_s12, 256, %s311_s3, [#allocation6], %s229_s21, %s229_s21, %s230_s22  }
  0x3e   :  { %226 = dma.done.wait [#allocation6], 256  }
  0x3f   :  { %227 = vsyncadd [#allocation6], 4294967040 }
  0x40   :  { %138 = vsyncpa [#allocation5], 1 }
  0x41   :  { %139 = vsyncpa [#allocation8], 1 }
  0x42   :  { %140 = vsyncpa [#allocation6], 1 }

</bundles_post_ra>
